<compile_context>
chip_gen: v7x
topology: tpu7x:2x2x1
jax: 0.10.0
libtpu: 0.0.40
codegen_flags: <defaults>
</compile_context>

<pallas_src>
import jax
import jax.numpy as jnp
from jax.experimental import pallas as pl
from jax.experimental.pallas import tpu as pltpu


LEAKY_SLOPE = 0.01          # torch.nn.LeakyReLU default
LANE = 128                  # TPU lane width
MAX_TB = 512                # batch tile (rows) upper bound


def _round_up(x, m):
    return ((x + m - 1) // m) * m


def _leaky_relu_f32(x):
    return jnp.where(x >= 0, x, LEAKY_SLOPE * x)


# --------------------------------------------------------------------------
# Kernel: whole 3-layer MLP for one batch tile, all operands resident in VMEM.
# --------------------------------------------------------------------------
def transition_mlp_kernel(s_ref, a_ref,
                          w1s_ref, w1a_ref, b1_ref,
                          w2_ref, b2_ref,
                          w3_ref, b3_ref,
                          out_ref):
    s = s_ref[...]            # bf16 [TB, obs_dim]
    a = a_ref[...]            # bf16 [TB, act_dim]

    # Layer 1: x @ W1 == state @ W1_s + action @ W1_a  (concat eliminated)
    h1 = jnp.dot(s, w1s_ref[...], preferred_element_type=jnp.float32)
    h1 = h1 + jnp.dot(a, w1a_ref[...], preferred_element_type=jnp.float32)
    h1 = _leaky_relu_f32(h1 + b1_ref[...])                 # f32 VPU path

    # Layer 2 (bf16 MXU operands, f32 accumulate)
    h2 = jnp.dot(h1.astype(jnp.bfloat16), w2_ref[...],
                 preferred_element_type=jnp.float32)
    h2 = _leaky_relu_f32(h2 + b2_ref[...])

    # Layer 3 (no activation)
    out = jnp.dot(h2.astype(jnp.bfloat16), w3_ref[...],
                  preferred_element_type=jnp.float32)
    out_ref[...] = (out + b3_ref[...]).astype(out_ref.dtype)


# --------------------------------------------------------------------------
# Wrapper
# --------------------------------------------------------------------------
@jax.jit
def transition_net_forward(state, action, params):
    B, obs_dim = state.shape
    act_dim = action.shape[1]
    h_pad = params["w2"].shape[0]          # padded hidden (128)
    out_pad = params["w3"].shape[1]        # padded obs_dim (128)

    # Batch tiling: TB rows per grid step, batch zero-padded to a multiple of TB.
    tb = min(MAX_TB, _round_up(B, 16))
    b_pad = _round_up(B, tb)
    if b_pad != B:
        pad = b_pad - B
        state = jnp.pad(state, ((0, pad), (0, 0)))
        action = jnp.pad(action, ((0, pad), (0, 0)))

    # bf16 activations halve HBM/VMEM traffic (f32 accumulate inside kernel).
    s = state.astype(jnp.bfloat16)
    a = action.astype(jnp.bfloat16)

    grid = (b_pad // tb,)

    row_spec = lambda f: pl.BlockSpec((tb, f), lambda i: (i, 0))
    # Weights/biases: full-extent blocks with a constant index_map -> resident.
    res_spec = lambda arr: pl.BlockSpec(arr.shape, lambda i: (0, 0))

    flops = 2 * b_pad * (obs_dim * h_pad + act_dim * h_pad
                         + h_pad * h_pad + h_pad * out_pad)
    bytes_accessed = (s.size * 2 + a.size * 2 + b_pad * out_pad * 4
                      + sum(int(params[k].size) * params[k].dtype.itemsize
                            for k in params))

    out = pl.pallas_call(
        transition_mlp_kernel,
        out_shape=jax.ShapeDtypeStruct((b_pad, out_pad), jnp.float32),
        grid=grid,
        in_specs=[
            row_spec(obs_dim),            # state tile
            row_spec(act_dim),            # action tile
            res_spec(params["w1s"]),
            res_spec(params["w1a"]),
            res_spec(params["b1"]),
            res_spec(params["w2"]),
            res_spec(params["b2"]),
            res_spec(params["w3"]),
            res_spec(params["b3"]),
        ],
        out_specs=pl.BlockSpec((tb, out_pad), lambda i: (i, 0)),
        compiler_params=pltpu.CompilerParams(
            dimension_semantics=("parallel",),        # megacore on v7x
            vmem_limit_bytes=32 * 1024 * 1024,        # ample headroom, v7x-safe
        ),
        cost_estimate=pl.CostEstimate(
            flops=flops, transcendentals=0, bytes_accessed=bytes_accessed),
    )(s, a,
      params["w1s"], params["w1a"], params["b1"],
      params["w2"], params["b2"],
      params["w3"], params["b3"])

    # Lane-dense kernel output -> slice padded rows / columns back off.
    return out[:B, :obs_dim]


# --------------------------------------------------------------------------
# Parameter construction (mirrors nn.init.orthogonal_ + zero bias),
# stored transposed ([in, out]), lane-padded to 128, weights in bf16.
# --------------------------------------------------------------------------
def orthogonal(key, rows, cols):
    n, m = max(rows, cols), min(rows, cols)
    a = jax.random.normal(key, (n, m), dtype=jnp.float32)
    q, r = jnp.linalg.qr(a)
    d = jnp.diagonal(r)
    q = q * jnp.where(d >= 0, 1.0, -1.0)        # sign fix (avoids sign(0)=0)
    q = q[:rows, :cols] if rows >= cols else q.T[:rows, :cols]
    return q


def _pad2d(a, rows, cols, dtype):
    out = jnp.zeros((rows, cols), dtype)
    return out.at[: a.shape[0], : a.shape[1]].set(a.astype(dtype))


def make_params(key, obs_dim, act_dim, hidden_dim):
    k1, k2, k3 = jax.random.split(key, 3)
    in_dim = obs_dim + act_dim
    h_pad = _round_up(hidden_dim, LANE)
    out_pad = _round_up(obs_dim, LANE)

    # PyTorch weights are [out, in]; orthogonal_ acts on that; we store [in, out].
    w1 = orthogonal(k1, hidden_dim, in_dim).T        # [in_dim, hidden]
    w2 = orthogonal(k2, hidden_dim, hidden_dim).T    # [hidden, hidden]
    w3 = orthogonal(k3, obs_dim, hidden_dim).T       # [hidden, obs_dim]

    return {
        # layer 1 split row-wise: state rows / action rows (concat removed)
        "w1s": _pad2d(w1[:obs_dim], obs_dim, h_pad, jnp.bfloat16),
        "w1a": _pad2d(w1[obs_dim:], act_dim, h_pad, jnp.bfloat16),
        "b1":  jnp.zeros((1, h_pad), jnp.float32),
        "w2":  _pad2d(w2, h_pad, h_pad, jnp.bfloat16),
        "b2":  jnp.zeros((1, h_pad), jnp.float32),
        "w3":  _pad2d(w3, h_pad, out_pad, jnp.bfloat16),
        "b3":  jnp.zeros((1, out_pad), jnp.float32),
    }


# --------------------------------------------------------------------------
# Pure-JAX reference (same bf16-operand / f32-accumulate path, no Pallas).
# --------------------------------------------------------------------------
def reference_forward(state, action, params):
    obs_dim = state.shape[1]
    s = state.astype(jnp.bfloat16)
    a = action.astype(jnp.bfloat16)
    h1 = (jnp.dot(s, params["w1s"], preferred_element_type=jnp.float32)
          + jnp.dot(a, params["w1a"], preferred_element_type=jnp.float32)
          + params["b1"])
    h1 = _leaky_relu_f32(h1)
    h2 = _leaky_relu_f32(
        jnp.dot(h1.astype(jnp.bfloat16), params["w2"],
                preferred_element_type=jnp.float32) + params["b2"])
    out = jnp.dot(h2.astype(jnp.bfloat16), params["w3"],
                  preferred_element_type=jnp.float32) + params["b3"]
    return out[:, :obs_dim]


if __name__ == "__main__":
    B, OBS_DIM, ACT_DIM, HIDDEN = 8, 16, 4, 32

    key = jax.random.PRNGKey(0)
    k_state, k_action, k_params, k_big = jax.random.split(key, 4)

    params = make_params(k_params, OBS_DIM, ACT_DIM, HIDDEN)

    # Small test (single tile, padded batch).
    state = jax.random.normal(k_state, (B, OBS_DIM), dtype=jnp.float32)
    action = jax.random.normal(k_action, (B, ACT_DIM), dtype=jnp.float32)
    out = jax.block_until_ready(transition_net_forward(state, action, params))
    ref = reference_forward(state, action, params)
    assert out.shape == (B, OBS_DIM)
    assert jnp.allclose(out, ref, atol=1e-3, rtol=1e-3), "mismatch vs reference (small)"

    # Larger test exercising the batch grid (multiple tiles + ragged padding).
    BIG = 600
    kb1, kb2 = jax.random.split(k_big)
    state_b = jax.random.normal(kb1, (BIG, OBS_DIM), dtype=jnp.float32)
    action_b = jax.random.normal(kb2, (BIG, ACT_DIM), dtype=jnp.float32)
    out_b = jax.block_until_ready(transition_net_forward(state_b, action_b, params))
    ref_b = reference_forward(state_b, action_b, params)
    assert out_b.shape == (BIG, OBS_DIM)
    assert jnp.allclose(out_b, ref_b, atol=1e-3, rtol=1e-3), "mismatch vs reference (big)"

    print("KERNEL_OK")
</pallas_src>

<mosaic_0001>
module attributes {stable_mosaic.version = 11 : i64} {
  func.func @transition_mlp_kernel(%arg0: i32, %arg1: memref<16x16xbf16, #tpu.memory_space<vmem>>, %arg2: memref<16x4xbf16, #tpu.memory_space<vmem>>, %arg3: memref<16x128xbf16, #tpu.memory_space<vmem>>, %arg4: memref<4x128xbf16, #tpu.memory_space<vmem>>, %arg5: memref<1x128xf32, #tpu.memory_space<vmem>>, %arg6: memref<128x128xbf16, #tpu.memory_space<vmem>>, %arg7: memref<1x128xf32, #tpu.memory_space<vmem>>, %arg8: memref<128x128xbf16, #tpu.memory_space<vmem>>, %arg9: memref<1x128xf32, #tpu.memory_space<vmem>>, %arg10: memref<16x128xf32, #tpu.memory_space<vmem>>) attributes {dimension_semantics = [#tpu.dimension_semantics<parallel>], iteration_bounds = array<i64: 1>, scalar_prefetch = 0 : i64, scratch_operands = 0 : i64, tpu.core_type = #tpu.core_type<tc>, window_params = [{transform_indices = @transform_0, window_bounds = array<i64: 16, 16>}, {transform_indices = @transform_1, window_bounds = array<i64: 16, 4>}, {pipeline_mode = #tpu.pipeline_mode<synchronous>, transform_indices = @transform_2, window_bounds = array<i64: 16, 128>}, {pipeline_mode = #tpu.pipeline_mode<synchronous>, transform_indices = @transform_3, window_bounds = array<i64: 4, 128>}, {pipeline_mode = #tpu.pipeline_mode<synchronous>, transform_indices = @transform_4, window_bounds = array<i64: 1, 128>}, {pipeline_mode = #tpu.pipeline_mode<synchronous>, transform_indices = @transform_5, window_bounds = array<i64: 128, 128>}, {pipeline_mode = #tpu.pipeline_mode<synchronous>, transform_indices = @transform_6, window_bounds = array<i64: 1, 128>}, {pipeline_mode = #tpu.pipeline_mode<synchronous>, transform_indices = @transform_7, window_bounds = array<i64: 128, 128>}, {pipeline_mode = #tpu.pipeline_mode<synchronous>, transform_indices = @transform_8, window_bounds = array<i64: 1, 128>}, {transform_indices = @transform_9, window_bounds = array<i64: 16, 128>}]} {
    %c0 = arith.constant 0 : index
    %c0_0 = arith.constant 0 : index
    %0 = vector.load %arg1[%c0, %c0_0] : memref<16x16xbf16, #tpu.memory_space<vmem>>, vector<16x16xbf16>
    %c0_1 = arith.constant 0 : index
    %c0_2 = arith.constant 0 : index
    %1 = vector.load %arg2[%c0_1, %c0_2] : memref<16x4xbf16, #tpu.memory_space<vmem>>, vector<16x4xbf16>
    %c0_3 = arith.constant 0 : index
    %c0_4 = arith.constant 0 : index
    %2 = vector.load %arg3[%c0_3, %c0_4] : memref<16x128xbf16, #tpu.memory_space<vmem>>, vector<16x128xbf16>
    %cst = arith.constant dense<0.000000e+00> : vector<16x128xf32>
    %3 = tpu.matmul %0, %2, %cst {dimension_numbers = #tpu.dot_dimension_numbers<[1], [0], [0], [1], [0, 0, 1, 1], [], []>} : vector<16x16xbf16>, vector<16x128xbf16>, vector<16x128xf32> -> vector<16x128xf32>
    %c0_5 = arith.constant 0 : index
    %c0_6 = arith.constant 0 : index
    %4 = vector.load %arg4[%c0_5, %c0_6] : memref<4x128xbf16, #tpu.memory_space<vmem>>, vector<4x128xbf16>
    %cst_7 = arith.constant dense<0.000000e+00> : vector<16x128xf32>
    %5 = tpu.matmul %1, %4, %cst_7 {dimension_numbers = #tpu.dot_dimension_numbers<[1], [0], [0], [1], [0, 0, 1, 1], [], []>} : vector<16x4xbf16>, vector<4x128xbf16>, vector<16x128xf32> -> vector<16x128xf32>
    %6 = arith.addf %3, %5 : vector<16x128xf32>
    %c0_8 = arith.constant 0 : index
    %c0_9 = arith.constant 0 : index
    %7 = vector.load %arg5[%c0_8, %c0_9] : memref<1x128xf32, #tpu.memory_space<vmem>>, vector<1x128xf32>
    %8 = vector.broadcast %7 : vector<1x128xf32> to vector<16x128xf32>
    %9 = arith.addf %6, %8 : vector<16x128xf32>
    %cst_10 = arith.constant 0.000000e+00 : f32
    %10 = vector.broadcast %cst_10 : f32 to vector<16x128xf32>
    %11 = arith.cmpf oge, %9, %10 : vector<16x128xf32>
    %cst_11 = arith.constant 0.00999999977 : f32
    %12 = vector.broadcast %cst_11 : f32 to vector<16x128xf32>
    %13 = arith.mulf %12, %9 : vector<16x128xf32>
    %14 = arith.select %11, %9, %13 : vector<16x128xi1>, vector<16x128xf32>
    %15 = arith.truncf %14 : vector<16x128xf32> to vector<16x128xbf16>
    %c0_12 = arith.constant 0 : index
    %c0_13 = arith.constant 0 : index
    %16 = vector.load %arg6[%c0_12, %c0_13] : memref<128x128xbf16, #tpu.memory_space<vmem>>, vector<128x128xbf16>
    %cst_14 = arith.constant dense<0.000000e+00> : vector<16x128xf32>
    %17 = tpu.matmul %15, %16, %cst_14 {dimension_numbers = #tpu.dot_dimension_numbers<[1], [0], [0], [1], [0, 0, 1, 1], [], []>} : vector<16x128xbf16>, vector<128x128xbf16>, vector<16x128xf32> -> vector<16x128xf32>
    %c0_15 = arith.constant 0 : index
    %c0_16 = arith.constant 0 : index
    %18 = vector.load %arg7[%c0_15, %c0_16] : memref<1x128xf32, #tpu.memory_space<vmem>>, vector<1x128xf32>
    %19 = vector.broadcast %18 : vector<1x128xf32> to vector<16x128xf32>
    %20 = arith.addf %17, %19 : vector<16x128xf32>
    %cst_17 = arith.constant 0.000000e+00 : f32
    %21 = vector.broadcast %cst_17 : f32 to vector<16x128xf32>
    %22 = arith.cmpf oge, %20, %21 : vector<16x128xf32>
    %cst_18 = arith.constant 0.00999999977 : f32
    %23 = vector.broadcast %cst_18 : f32 to vector<16x128xf32>
    %24 = arith.mulf %23, %20 : vector<16x128xf32>
    %25 = arith.select %22, %20, %24 : vector<16x128xi1>, vector<16x128xf32>
    %26 = arith.truncf %25 : vector<16x128xf32> to vector<16x128xbf16>
    %c0_19 = arith.constant 0 : index
    %c0_20 = arith.constant 0 : index
    %27 = vector.load %arg8[%c0_19, %c0_20] : memref<128x128xbf16, #tpu.memory_space<vmem>>, vector<128x128xbf16>
    %cst_21 = arith.constant dense<0.000000e+00> : vector<16x128xf32>
    %28 = tpu.matmul %26, %27, %cst_21 {dimension_numbers = #tpu.dot_dimension_numbers<[1], [0], [0], [1], [0, 0, 1, 1], [], []>} : vector<16x128xbf16>, vector<128x128xbf16>, vector<16x128xf32> -> vector<16x128xf32>
    %c0_22 = arith.constant 0 : index
    %c0_23 = arith.constant 0 : index
    %29 = vector.load %arg9[%c0_22, %c0_23] : memref<1x128xf32, #tpu.memory_space<vmem>>, vector<1x128xf32>
    %30 = vector.broadcast %29 : vector<1x128xf32> to vector<16x128xf32>
    %31 = arith.addf %28, %30 : vector<16x128xf32>
    %c0_24 = arith.constant 0 : index
    %c0_25 = arith.constant 0 : index
    %32 = vector.load %arg10[%c0_24, %c0_25] : memref<16x128xf32, #tpu.memory_space<vmem>>, vector<16x128xf32>
    tpu.vector_store %arg10[%c0_24, %c0_25], %31 {strides = array<i32>} : memref<16x128xf32, #tpu.memory_space<vmem>>, vector<16x128xf32>,
    return
  }
  func.func @transform_0(%arg0: i32) -> (i32, i32) {
    %c0_i32 = arith.constant 0 : i32
    %c0_i32_0 = arith.constant 0 : i32
    return %arg0, %c0_i32 : i32, i32
  }
  func.func @transform_1(%arg0: i32) -> (i32, i32) {
    %c0_i32 = arith.constant 0 : i32
    %c0_i32_0 = arith.constant 0 : i32
    return %arg0, %c0_i32 : i32, i32
  }
  func.func @transform_2(%arg0: i32) -> (i32, i32) {
    %c0_i32 = arith.constant 0 : i32
    %c0_i32_0 = arith.constant 0 : i32
    %c0_i32_1 = arith.constant 0 : i32
    return %c0_i32, %c0_i32_0 : i32, i32
  }
  func.func @transform_3(%arg0: i32) -> (i32, i32) {
    %c0_i32 = arith.constant 0 : i32
    %c0_i32_0 = arith.constant 0 : i32
    %c0_i32_1 = arith.constant 0 : i32
    return %c0_i32, %c0_i32_0 : i32, i32
  }
  func.func @transform_4(%arg0: i32) -> (i32, i32) {
    %c0_i32 = arith.constant 0 : i32
    %c0_i32_0 = arith.constant 0 : i32
    %c0_i32_1 = arith.constant 0 : i32
    return %c0_i32, %c0_i32_0 : i32, i32
  }
  func.func @transform_5(%arg0: i32) -> (i32, i32) {
    %c0_i32 = arith.constant 0 : i32
    %c0_i32_0 = arith.constant 0 : i32
    %c0_i32_1 = arith.constant 0 : i32
    return %c0_i32, %c0_i32_0 : i32, i32
  }
  func.func @transform_6(%arg0: i32) -> (i32, i32) {
    %c0_i32 = arith.constant 0 : i32
    %c0_i32_0 = arith.constant 0 : i32
    %c0_i32_1 = arith.constant 0 : i32
    return %c0_i32, %c0_i32_0 : i32, i32
  }
  func.func @transform_7(%arg0: i32) -> (i32, i32) {
    %c0_i32 = arith.constant 0 : i32
    %c0_i32_0 = arith.constant 0 : i32
    %c0_i32_1 = arith.constant 0 : i32
    return %c0_i32, %c0_i32_0 : i32, i32
  }
  func.func @transform_8(%arg0: i32) -> (i32, i32) {
    %c0_i32 = arith.constant 0 : i32
    %c0_i32_0 = arith.constant 0 : i32
    %c0_i32_1 = arith.constant 0 : i32
    return %c0_i32, %c0_i32_0 : i32, i32
  }
  func.func @transform_9(%arg0: i32) -> (i32, i32) {
    %c0_i32 = arith.constant 0 : i32
    %c0_i32_0 = arith.constant 0 : i32
    return %arg0, %c0_i32 : i32, i32
  }
}

</mosaic_0001>

<bundles_post_ra>
// kernel: transition_net_forward.1
= control target key start
LH: loop header
LB: loop body
LE: loop exit
PB: predicated region body
PF: predicated region fallthrough
CT: control target
= control target key end

     0   :  { %14 = vsyncpa [#allocation3], 0  ;;  %s756_s0 = inlined_call_operand.vmem [shape: bf16[16,16], index: 0, kind: input, shape index: {}]   ;;  %s757_s1 = inlined_call_operand.vmem [shape: bf16[16,4], index: 1, kind: input, shape index: {}]   ;;  %s758_s2 = inlined_call_operand.vmem [shape: bf16[16,128], index: 2, kind: input, shape index: {}]   ;;  %s759_s3 = inlined_call_operand.vmem [shape: bf16[4,128], index: 3, kind: input, shape index: {}]   ;;  %s760_s4 = inlined_call_operand.vmem [shape: f32[1,128], index: 4, kind: input, shape index: {}]   ;;  %s761_s5 = inlined_call_operand.vmem [shape: bf16[128,128], index: 5, kind: input, shape index: {}]   ;;  %s762_s6 = inlined_call_operand.vmem [shape: f32[1,128], index: 6, kind: input, shape index: {}]   ;;  %s763_s7 = inlined_call_operand.hbm [shape: bf16[128,128], index: 7, kind: input, shape index: {}]   ;;  %s764_s8 = inlined_call_operand.hbm [shape: f32[1,128], index: 8, kind: input, shape index: {}]   ;;  %s765_s9 = inlined_call_operand.vmem [shape: f32[16,128], index: 9, kind: output, shape index: {}]  }
   0x1   :  { %15 = vsyncpa [#allocation5], 0  ;;  %s602_s30 = smov [#allocation2]   ;;  %s554_s13 = scalar_lea.hbm %s763_s7, 1024 }
   0x2   :  { %s35_s10 = sshll.u32 %s602_s30, 4  ;;  %p555_p0 = scmp.ne.s32.totalorder %s763_s7, %s554_s13  ;;  %s36_s10 = int_to_ptr.vmem [resolvable:$true] %s35_s10 }
   0x3   :  { %p558_p1 = scmp.lt.u32.totalorder %s554_s13, %s763_s7 }
   0x5   :  { %p560_p2 = pnand %p558_p1, %p555_p0 }
   0x7   :  { %563 = shalt.err (!%p560_p2)
}
   0x8   :  { %s564_s18 = scalar_lea.vmem %s36_s10, 1024  ;;  %p569_p4 = scmp.lt.s32.totalorder %s36_s10, %s36_s10 }
   0x9   :  { %p565_p3 = scmp.ne.s32.totalorder %s36_s10, %s564_s18  ;;  %p570_p5 = scmp.lt.s32.totalorder %s564_s18, %s564_s18 }
   0xb   :  { %p571_p6 = por %p570_p5, %p569_p4 }
   0xd   :  { %p572_p7 = pnand %p571_p6, %p565_p3 }
   0xf   :  { %575 = shalt.err (!%p572_p7)
}
  0x10   :  { %s603_s19 = smov 64   ;;  %s604_s20 = smov 4  }
  0x11   :  { %41 = dma.hbm_to_vmem [thread:$0]  %s763_s7, 1024, %s36_s10, [#allocation3], %s603_s19, %s603_s19, %s604_s20  }
  0x12   :  { %s605_s23 = smov [#allocation4]   ;;  %s576_s27 = scalar_lea.hbm %s764_s8, 16 }
  0x13   :  { %s48_s24 = sshll.u32 %s605_s23, 4  ;;  %p577_p8 = scmp.ne.s32.totalorder %s764_s8, %s576_s27  ;;  %s49_s24 = int_to_ptr.vmem [resolvable:$true] %s48_s24 }
  0x14   :  { %p580_p9 = scmp.lt.u32.totalorder %s576_s27, %s764_s8 }
  0x16   :  { %p582_p10 = pnand %p580_p9, %p577_p8 }
  0x18   :  { %585 = shalt.err (!%p582_p10)
}
  0x19   :  { %s586_s12 = scalar_lea.vmem %s49_s24, 16  ;;  %s590_s7 = scalar_lea.vmem %s49_s24, 32 }
  0x1a   :  { %p587_p11 = scmp.ne.s32.totalorder %s49_s24, %s586_s12  ;;  %p591_p12 = scmp.lt.s32.totalorder %s49_s24, %s49_s24 }
  0x1b   :  { %p592_p13 = scmp.lt.s32.totalorder %s590_s7, %s586_s12 }
  0x1d   :  { %p593_p0 = por %p592_p13, %p591_p12 }
  0x1f   :  { %p594_p1 = pnand %p593_p0, %p587_p11 }
  0x21   :  { %597 = shalt.err (!%p594_p1)
}
  0x22   :  { %51 = dma.hbm_to_vmem [thread:$0]  %s764_s8, 16, %s49_s24, [#allocation5]  }
  0x23   :  { %598 = dma.done.wait [#allocation3], 1024  }
  0x24   :  { %599 = vsyncadd [#allocation3], 4294966272 }
  0x25   :  { %600 = dma.done.wait [#allocation5], 16  }
  0x26   :  { %601 = vsyncadd [#allocation5], 4294967280  ;;  %v606_v0 = vmov 0.0   ;;  %vm607_vm0 = vmmov 0   ;;  %vm75_vm1 = vcmask 1041408   ;;  %v535_v3 = vld [vmem:[%s758_s2] sm:$0xff]  }
  0x27   :  { %477 = vmatprep.subr.bf16.mxu0 %v606_v0  ;;  %483 = vmatprep.subr.bf16.mxu1 %v606_v0  ;;  %v65_v1 = vld [vmem:[%s759_s3] sm:$0x3]  ;;  %vm71_vm2 = vcmask 31744   ;;  %vm131_vm3 = vcmask 130048   ;;  %v539_v7 = vld [vmem:[%s761_s5 + $0x8] sm:$0xff]   ;;  %v540_v8 = vld [vmem:[%s761_s5 + $0x10] sm:$0xff]  }
  0x28   :  { %479 = vmatprep.mubr.msk.bf16.mxu0 %vm607_vm0, %v606_v0  ;;  %485 = vmatprep.mubr.msk.bf16.mxu1 %vm607_vm0, %v606_v0  ;;  %v77_v2 = vsel %vm75_vm1, %v65_v1, 0  ;;  %v536_v4 = vld [vmem:[%s757_s1] sm:$0xff]   ;;  %v541_v9 = vld [vmem:[%s761_s5 + $0x18] sm:$0xff]   ;;  %v543_v11 = vld [vmem:[%s761_s5 + $0x28] sm:$0xff]  }
  0x29   :  { %478 = vmatpush3.bf16.msra.mxu0 %v77_v2  ;;  %484 = vmatpush3.bf16.msra.mxu1 %v535_v3  ;;  %v537_v5 = vld [vmem:[%s756_s0] sm:$0xff]   ;;  %v544_v12 = vld [vmem:[%s761_s5 + $0x30] sm:$0xff]   ;;  %v545_v13 = vld [vmem:[%s761_s5 + $0x38] sm:$0xff]  }
  0x2a   :  { %489 = vmatprep.subr.bf16.mxu0 %v606_v0  ;;  %v538_v6 = vld [vmem:[%s761_s5] sm:$0xff]   ;;  %509 = vmatprep.subr.bf16.mxu1 %v606_v0  ;;  %v547_v15 = vld [vmem:[#allocation2 + $0x8] sm:$0xff]   ;;  %v548_v16 = vld [vmem:[#allocation2 + $0x10] sm:$0xff]  }
  0x2b   :  { %v542_v10 = vld [vmem:[%s761_s5 + $0x20] sm:$0xff]   ;;  %v549_v17 = vld [vmem:[#allocation2 + $0x18] sm:$0xff]   ;;  %v551_v19 = vld [vmem:[#allocation2 + $0x28] sm:$0xff]  }
  0x2c   :  { %480 = vmatmul.mubr.msk.bf16.vlgmr.msra.gmra.mrb[0].mxu0 %vm71_vm2, %v536_v4  ;;  %486 = vmatmul.mubr.msk.bf16.vlgmr.msra.gmra.mrb[0].mxu1 %vm131_vm3, %v537_v5  ;;  %v546_v14 = vld [vmem:[#allocation2] sm:$0xff]   ;;  %v552_v38 = vld [vmem:[#allocation2 + $0x30] sm:$0xff]   ;;  %v553_v39 = vld [vmem:[#allocation2 + $0x38] sm:$0xff]  }
  0x2d   :  { %490 = vmatpush3.bf16.msra.mxu0 %v538_v6  ;;  %505 = vmatprep.mubr.msk.bf16.mxu0 %vm607_vm0, %v606_v0  ;;  %v550_v18 = vld [vmem:[#allocation2 + $0x20] sm:$0xff]  }
  0x2e   :  { %491 = vmatprep.subr.bf16.mxu0 %v606_v0  ;;  %525 = vmatprep.mubr.msk.bf16.mxu1 %vm607_vm0, %v606_v0  ;;  %v436_v23 = vld [vmem:[%s760_s4] ss:$0 sm:$0xff] }
  0x2f   :  { %510 = vmatpush3.bf16.msra.mxu1 %v546_v14  ;;  %v437_v40 = vld [vmem:[%s762_s6] ss:$0 sm:$0xff] }
  0x30   :  { %511 = vmatprep.subr.bf16.mxu1 %v606_v0  ;;  %v446_v52 = vld [vmem:[#allocation4] ss:$0 sm:$0xff] }
  0x31   :  { %492 = vmatpush3.bf16.msra.mxu0 %v539_v7 }
  0x32   :  { %493 = vmatprep.subr.bf16.mxu0 %v606_v0 }
  0x33   :  { %512 = vmatpush3.bf16.msra.mxu1 %v547_v15 }
  0x34   :  { %513 = vmatprep.subr.bf16.mxu1 %v606_v0 }
  0x35   :  { %494 = vmatpush3.bf16.msra.mxu0 %v540_v8 }
  0x36   :  { %495 = vmatprep.subr.bf16.mxu0 %v606_v0 }
  0x37   :  { %514 = vmatpush3.bf16.msra.mxu1 %v548_v16 }
  0x38   :  { %515 = vmatprep.subr.bf16.mxu1 %v606_v0 }
  0x39   :  { %496 = vmatpush3.bf16.msra.mxu0 %v541_v9 }
  0x3a   :  { %497 = vmatprep.subr.bf16.mxu0 %v606_v0 }
  0x3b   :  { %516 = vmatpush3.bf16.msra.mxu1 %v549_v17 }
  0x3c   :  { %517 = vmatprep.subr.bf16.mxu1 %v606_v0 }
  0x3d   :  { %498 = vmatpush3.bf16.msra.mxu0 %v542_v10 }
  0x3e   :  { %499 = vmatprep.subr.bf16.mxu0 %v606_v0 }
  0x3f   :  { %518 = vmatpush3.bf16.msra.mxu1 %v550_v18 }
  0x40   :  { %519 = vmatprep.subr.bf16.mxu1 %v606_v0 }
  0x41   :  { %500 = vmatpush3.bf16.msra.mxu0 %v543_v11 }
  0x42   :  { %501 = vmatprep.subr.bf16.mxu0 %v606_v0 }
  0x43   :  { %520 = vmatpush3.bf16.msra.mxu1 %v551_v19 }
  0x44   :  { %521 = vmatprep.subr.bf16.mxu1 %v606_v0 }
  0x45   :  { %502 = vmatpush3.bf16.msra.mxu0 %v544_v12 }
  0x46   :  { %503 = vmatprep.subr.bf16.mxu0 %v606_v0 }
  0x47   :  { %522 = vmatpush3.bf16.msra.mxu1 %v552_v38 }
  0x48   :  { %523 = vmatprep.subr.bf16.mxu1 %v606_v0 }
  0x49   :  { %504 = vmatpush3.bf16.msra.mxu0 %v545_v13 }
  0x4b   :  { %524 = vmatpush3.bf16.msra.mxu1 %v553_v39 }
  0xff   :  { %v113_v20 = vpop.f32.mrb[0].mxu0  ;;  %v169_v22 = vpop.f32.mrb[0].mxu1 }
 0x100   :  { %v481_v21 = vpop.f32.mrb[1].mxu0  ;;  %v170_v24 = vadd.f32 %v169_v22, %v113_v20  ;;  %v487_v26 = vpop.f32.mrb[1].mxu1 }
 0x101   :  { %v116_v25 = vpop.f32.mrb[2].mxu0  ;;  %v172_v28 = vpop.f32.mrb[2].mxu1 }
 0x102   :  { %v482_v27 = vpop.f32.mrb[3].mxu0  ;;  %v183_v29 = vadd.f32 %v436_v23, %v170_v24  ;;  %v173_v30 = vadd.f32 %v172_v28, %v116_v25  ;;  %v488_v31 = vpop.f32.mrb[3].mxu1 }
 0x104   :  { %v187_v32 = vmul.f32 0.01, %v183_v29  ;;  %v184_v33 = vadd.f32 %v436_v23, %v173_v30  ;;  %vm185_vm4 = vcmp.ge.f32.partialorder %v183_v29, 0.0 }
 0x106   :  { %vm186_vm5 = vcmp.ge.f32.partialorder %v184_v33, 0.0  ;;  %v188_v34 = vmul.f32 0.01, %v184_v33  ;;  %v189_v35 = vsel %vm185_vm4, %v183_v29, %v187_v32 }
 0x108   :  { %v190_v36 = vsel %vm186_vm5, %v184_v33, %v188_v34 }
 0x109   :  { %v191_v37 = vpack.c.bf16 %v190_v36, %v189_v35 }
 0x10b   :  { %506 = vmatmul.mubr.bf16.vlgmr.msra.gmra.mrb[4].mxu0 %v191_v37 }
 0x1de   :  { %v297_v41 = vpop.f32.mrb[4].mxu0 }
 0x1df   :  { %v298_v42 = vadd.f32 %v437_v40, %v297_v41  ;;  %v507_v43 = vpop.f32.mrb[5].mxu0 }
 0x1e0   :  { %v300_v44 = vpop.f32.mrb[6].mxu0 }
 0x1e1   :  { %v306_v45 = vmul.f32 0.01, %v298_v42  ;;  %v301_v46 = vadd.f32 %v437_v40, %v300_v44  ;;  %v508_v47 = vpop.f32.mrb[7].mxu0  ;;  %vm304_vm6 = vcmp.ge.f32.partialorder %v298_v42, 0.0 }
 0x1e3   :  { %vm305_vm7 = vcmp.ge.f32.partialorder %v301_v46, 0.0  ;;  %v307_v48 = vmul.f32 0.01, %v301_v46  ;;  %v308_v49 = vsel %vm304_vm6, %v298_v42, %v306_v45 }
 0x1e5   :  { %v309_v50 = vsel %vm305_vm7, %v301_v46, %v307_v48 }
 0x1e6   :  { %v310_v51 = vpack.c.bf16 %v309_v50, %v308_v49 }
 0x1e8   :  { %526 = vmatmul.mubr.bf16.vlgmr.msra.gmra.mrb[4].mxu1 %v310_v51 }
 0x2bb   :  { %v416_v53 = vpop.f32.mrb[4].mxu1 }
 0x2bc   :  { %v417_v54 = vadd.f32 %v446_v52, %v416_v53  ;;  %v527_v55 = vpop.f32.mrb[5].mxu1 }
 0x2bd   :  { %v419_v56 = vpop.f32.mrb[6].mxu1 }
 0x2be   :  { %423 = vst [vmem:[%s765_s9] sm:$0xff] %v417_v54  ;;  %v420_v57 = vadd.f32 %v446_v52, %v419_v56  ;;  %v528_v58 = vpop.f32.mrb[7].mxu1 }
 0x2c0   :  { %424 = vst [vmem:[%s765_s9 + $0x8] sm:$0xff] %v420_v57 }
 0x2c1   :  { %429 = vsyncpa [#allocation3], 1 }
 0x2c2   :  { %430 = vsyncpa [#allocation5], 1 }

</bundles_post_ra>
